<compile_context>
chip_gen: v7x
topology: tpu7x:2x2x1
jax: 0.10.0
libtpu: 0.0.40
codegen_flags: <defaults>
</compile_context>

<pallas_src>
import jax
import jax.numpy as jnp
from jax import lax
from jax.experimental import pallas as pl
from jax.experimental.pallas import tpu as pltpu


def _make_dsconv_kernel(H, W, dilation, relu):
    """Build the kernel closure for static H, W, dilation, relu."""

    def kernel(x_ref, rc_ref, dww_ref, b1_ref, a1_ref, wpw_ref, b2_ref, a2_ref, o_ref):
        f32 = jnp.float32
        x = x_ref[...].astype(f32)                  # (C_in, L) lane-dense slab
        C_in, L = x.shape
        C_out = o_ref.shape[0]

        # row/col index of every flattened position (within its own image)
        row = rc_ref[0:1, :]                        # (1, L) int32
        col = rc_ref[1:2, :]                        # (1, L) int32
        row_ok_u = (row >= dilation).astype(f32)            # may read `dilation` rows up
        row_ok_d = (row <= H - 1 - dilation).astype(f32)    # may read `dilation` rows down
        col_ok_l = (col >= dilation).astype(f32)
        col_ok_r = (col <= W - 1 - dilation).astype(f32)

        # ---- depthwise 3x3 conv (stride 1, zero pad = dilation), BN1 scale folded in
        acc = jnp.zeros((C_in, L), f32)
        k = 0
        for dh in (-1, 0, 1):
            for dw in (-1, 0, 1):
                off = (dh * W + dw) * dilation
                shifted = x if off == 0 else pltpu.roll(x, shift=(-off) % L, axis=1)
                tap = shifted * dww_ref[:, k:k + 1]          # (C_in,1) per-channel weight
                if dh == -1:
                    tap = tap * row_ok_u
                elif dh == 1:
                    tap = tap * row_ok_d
                if dw == -1:
                    tap = tap * col_ok_l
                elif dw == 1:
                    tap = tap * col_ok_r
                acc = acc + tap
                k += 1

        y = acc + b1_ref[...]                                # BN1 shift (C_in,1)
        y = jnp.where(y >= 0, y, a1_ref[...] * y)            # PReLU (per input channel)

        # ---- pointwise 1x1 conv (BN2 scale folded) as C_in VPU broadcast-FMAs
        out = jnp.zeros((C_out, L), f32) + b2_ref[...]       # BN2 shift (C_out,1)
        for ic in range(C_in):
            out = out + wpw_ref[:, ic:ic + 1] * y[ic:ic + 1, :]
        if relu:
            out = jnp.where(out >= 0, out, a2_ref[...] * out)  # PReLU (per output channel)
        o_ref[...] = out.astype(o_ref.dtype)

    return kernel


def dsconv3x3_forward(x_nchw,
                      dw_weight, bn1_gamma, bn1_beta, bn1_mean, bn1_var, prelu1_alpha,
                      pw_weight, bn2_gamma, bn2_beta, bn2_mean, bn2_var, prelu2_alpha,
                      *, stride=1, dilation=1, relu=True, bn_eps=1e-5):
    assert stride == 1, "TODO(synk): stride > 1 not implemented"
    N, C, H, W = x_nchw.shape
    C_out = pw_weight.shape[0]
    HW = H * W
    L = N * HW

    # lane-dense layout: channels on sublanes, (batch * spatial) on lanes
    x2d = jnp.transpose(x_nchw, (1, 0, 2, 3)).reshape(C, L)

    # per-position row/col indices (for pad masks); computed once on the host
    p = jnp.arange(L, dtype=jnp.int32) % HW
    rowcol = jnp.stack([p // W, p % W]).astype(jnp.int32)            # (2, L)

    # fold BatchNorm (inference) into conv weights / biases
    scale1 = bn1_gamma / jnp.sqrt(bn1_var + bn_eps)
    shift1 = bn1_beta - bn1_mean * scale1
    dww = dw_weight[:, 0, :, :].reshape(C, 9) * scale1[:, None]      # (C, 9)
    b1 = shift1.reshape(C, 1)
    a1 = prelu1_alpha.reshape(C, 1)

    scale2 = bn2_gamma / jnp.sqrt(bn2_var + bn_eps)
    shift2 = bn2_beta - bn2_mean * scale2
    wpw = pw_weight[:, :, 0, 0] * scale2[:, None]                    # (C_out, C)
    b2 = shift2.reshape(C_out, 1)
    a2 = prelu2_alpha.reshape(C_out, 1)

    kernel = _make_dsconv_kernel(H, W, dilation, relu)

    out2d = pl.pallas_call(
        kernel,
        out_shape=jax.ShapeDtypeStruct((C_out, L), x_nchw.dtype),
        grid=(1,),
        in_specs=[
            pl.BlockSpec((C, L), lambda i: (0, 0)),          # x (lane-dense)
            pl.BlockSpec((2, L), lambda i: (0, 0)),          # row/col indices
            pl.BlockSpec((C, 9), lambda i: (0, 0)),          # depthwise weights (BN1 folded)
            pl.BlockSpec((C, 1), lambda i: (0, 0)),          # BN1 shift
            pl.BlockSpec((C, 1), lambda i: (0, 0)),          # PReLU1 alpha
            pl.BlockSpec((C_out, C), lambda i: (0, 0)),      # pointwise weights (BN2 folded)
            pl.BlockSpec((C_out, 1), lambda i: (0, 0)),      # BN2 shift
            pl.BlockSpec((C_out, 1), lambda i: (0, 0)),      # PReLU2 alpha
        ],
        out_specs=pl.BlockSpec((C_out, L), lambda i: (0, 0)),
        compiler_params=pltpu.CompilerParams(dimension_semantics=("arbitrary",)),
    )(x2d, rowcol, dww, b1, a1, wpw, b2, a2)

    return jnp.transpose(out2d.reshape(C_out, N, H, W), (1, 0, 2, 3))


def dsconv3x3_reference(x, dw_weight, g1, be1, m1, v1, a1,
                        pw_weight, g2, be2, m2, v2, a2,
                        *, dilation=1, relu=True, eps=1e-5):
    """Pure-JAX reference mirroring the PyTorch forward (NCHW, inference BN)."""
    C = x.shape[1]
    y = lax.conv_general_dilated(
        x, dw_weight, window_strides=(1, 1),
        padding=[(dilation, dilation), (dilation, dilation)],
        rhs_dilation=(dilation, dilation),
        dimension_numbers=('NCHW', 'OIHW', 'NCHW'),
        feature_group_count=C)
    y = (y - m1[None, :, None, None]) / jnp.sqrt(v1 + eps)[None, :, None, None]
    y = y * g1[None, :, None, None] + be1[None, :, None, None]
    y = jnp.where(y >= 0, y, a1[None, :, None, None] * y)

    z = lax.conv_general_dilated(
        y, pw_weight, window_strides=(1, 1), padding='VALID',
        dimension_numbers=('NCHW', 'OIHW', 'NCHW'))
    z = (z - m2[None, :, None, None]) / jnp.sqrt(v2 + eps)[None, :, None, None]
    z = z * g2[None, :, None, None] + be2[None, :, None, None]
    if relu:
        z = jnp.where(z >= 0, z, a2[None, :, None, None] * z)
    return z


if __name__ == "__main__":
    key = jax.random.PRNGKey(0)
    ks = jax.random.split(key, 16)

    N, C_in, C_out, H, W = 2, 4, 8, 16, 16
    x = jax.random.normal(ks[0], (N, C_in, H, W), dtype=jnp.float32)

    # depthwise 3x3 conv (groups=C_in) + BN + PReLU parameters
    dw_w = jax.random.normal(ks[1], (C_in, 1, 3, 3), dtype=jnp.float32) * 0.3
    bn1_g = 1.0 + 0.1 * jax.random.normal(ks[2], (C_in,), dtype=jnp.float32)
    bn1_b = 0.1 * jax.random.normal(ks[3], (C_in,), dtype=jnp.float32)
    bn1_m = 0.1 * jax.random.normal(ks[4], (C_in,), dtype=jnp.float32)
    bn1_v = 0.5 + jnp.abs(jax.random.normal(ks[5], (C_in,), dtype=jnp.float32)) * 0.5
    pr1_a = 0.25 + 0.05 * jax.random.normal(ks[6], (C_in,), dtype=jnp.float32)

    # pointwise 1x1 conv + BN + PReLU parameters
    pw_w = jax.random.normal(ks[7], (C_out, C_in, 1, 1), dtype=jnp.float32) * 0.3
    bn2_g = 1.0 + 0.1 * jax.random.normal(ks[8], (C_out,), dtype=jnp.float32)
    bn2_b = 0.1 * jax.random.normal(ks[9], (C_out,), dtype=jnp.float32)
    bn2_m = 0.1 * jax.random.normal(ks[10], (C_out,), dtype=jnp.float32)
    bn2_v = 0.5 + jnp.abs(jax.random.normal(ks[11], (C_out,), dtype=jnp.float32)) * 0.5
    pr2_a = 0.25 + 0.05 * jax.random.normal(ks[12], (C_out,), dtype=jnp.float32)

    out = dsconv3x3_forward(x, dw_w, bn1_g, bn1_b, bn1_m, bn1_v, pr1_a,
                            pw_w, bn2_g, bn2_b, bn2_m, bn2_v, pr2_a)
    out = jax.block_until_ready(out)

    ref = dsconv3x3_reference(x, dw_w, bn1_g, bn1_b, bn1_m, bn1_v, pr1_a,
                              pw_w, bn2_g, bn2_b, bn2_m, bn2_v, pr2_a)

    assert out.shape == (N, C_out, H, W) and out.dtype == jnp.float32
    assert jnp.allclose(out, ref, atol=1e-4, rtol=1e-4), "Pallas kernel mismatch vs reference"

    print("KERNEL_OK")
</pallas_src>

<mosaic_0001>
module attributes {stable_mosaic.version = 11 : i64} {
  func.func @kernel(%arg0: i32, %arg1: memref<4x512xf32, #tpu.memory_space<vmem>>, %arg2: memref<2x512xi32, #tpu.memory_space<vmem>>, %arg3: memref<4x9xf32, #tpu.memory_space<vmem>>, %arg4: memref<4x1xf32, #tpu.memory_space<vmem>>, %arg5: memref<4x1xf32, #tpu.memory_space<vmem>>, %arg6: memref<8x4xf32, #tpu.memory_space<vmem>>, %arg7: memref<8x1xf32, #tpu.memory_space<vmem>>, %arg8: memref<8x1xf32, #tpu.memory_space<vmem>>, %arg9: memref<8x512xf32, #tpu.memory_space<vmem>>) attributes {dimension_semantics = [#tpu.dimension_semantics<arbitrary>], iteration_bounds = array<i64: 1>, scalar_prefetch = 0 : i64, scratch_operands = 0 : i64, tpu.core_type = #tpu.core_type<tc>, window_params = [{pipeline_mode = #tpu.pipeline_mode<synchronous>, transform_indices = @transform_0, window_bounds = array<i64: 4, 512>}, {pipeline_mode = #tpu.pipeline_mode<synchronous>, transform_indices = @transform_1, window_bounds = array<i64: 2, 512>}, {pipeline_mode = #tpu.pipeline_mode<synchronous>, transform_indices = @transform_2, window_bounds = array<i64: 4, 9>}, {pipeline_mode = #tpu.pipeline_mode<synchronous>, transform_indices = @transform_3, window_bounds = array<i64: 4, 1>}, {pipeline_mode = #tpu.pipeline_mode<synchronous>, transform_indices = @transform_4, window_bounds = array<i64: 4, 1>}, {pipeline_mode = #tpu.pipeline_mode<synchronous>, transform_indices = @transform_5, window_bounds = array<i64: 8, 4>}, {pipeline_mode = #tpu.pipeline_mode<synchronous>, transform_indices = @transform_6, window_bounds = array<i64: 8, 1>}, {pipeline_mode = #tpu.pipeline_mode<synchronous>, transform_indices = @transform_7, window_bounds = array<i64: 8, 1>}, {pipeline_mode = #tpu.pipeline_mode<synchronous>, transform_indices = @transform_8, window_bounds = array<i64: 8, 512>}]} {
    %c0 = arith.constant 0 : index
    %c0_0 = arith.constant 0 : index
    %0 = vector.load %arg1[%c0, %c0_0] : memref<4x512xf32, #tpu.memory_space<vmem>>, vector<4x512xf32>
    %c0_1 = arith.constant 0 : index
    %c0_2 = arith.constant 0 : index
    %1 = vector.load %arg2[%c0_1, %c0_2] : memref<2x512xi32, #tpu.memory_space<vmem>>, vector<1x512xi32>
    %c1 = arith.constant 1 : index
    %c0_3 = arith.constant 0 : index
    %2 = vector.load %arg2[%c1, %c0_3] : memref<2x512xi32, #tpu.memory_space<vmem>>, vector<1x512xi32>
    %c1_i32 = arith.constant 1 : i32
    %3 = vector.broadcast %c1_i32 : i32 to vector<1x512xi32>
    %4 = arith.cmpi sge, %1, %3 : vector<1x512xi32>
    %5 = arith.extui %4 : vector<1x512xi1> to vector<1x512xi32>
    %6 = arith.sitofp %5 : vector<1x512xi32> to vector<1x512xf32>
    %c14_i32 = arith.constant 14 : i32
    %7 = vector.broadcast %c14_i32 : i32 to vector<1x512xi32>
    %8 = arith.cmpi sle, %1, %7 : vector<1x512xi32>
    %9 = arith.extui %8 : vector<1x512xi1> to vector<1x512xi32>
    %10 = arith.sitofp %9 : vector<1x512xi32> to vector<1x512xf32>
    %c1_i32_4 = arith.constant 1 : i32
    %11 = vector.broadcast %c1_i32_4 : i32 to vector<1x512xi32>
    %12 = arith.cmpi sge, %2, %11 : vector<1x512xi32>
    %13 = arith.extui %12 : vector<1x512xi1> to vector<1x512xi32>
    %14 = arith.sitofp %13 : vector<1x512xi32> to vector<1x512xf32>
    %c14_i32_5 = arith.constant 14 : i32
    %15 = vector.broadcast %c14_i32_5 : i32 to vector<1x512xi32>
    %16 = arith.cmpi sle, %2, %15 : vector<1x512xi32>
    %17 = arith.extui %16 : vector<1x512xi1> to vector<1x512xi32>
    %18 = arith.sitofp %17 : vector<1x512xi32> to vector<1x512xf32>
    %cst = arith.constant 0.000000e+00 : f32
    %19 = vector.broadcast %cst : f32 to vector<4x512xf32>
    %c17_i32 = arith.constant 17 : i32
    %20 = tpu.dynamic_rotate %0 by %c17_i32 dim 1 : vector<4x512xf32>, i32 -> vector<4x512xf32>
    %c0_6 = arith.constant 0 : index
    %c0_7 = arith.constant 0 : index
    %21 = vector.load %arg3[%c0_6, %c0_7] : memref<4x9xf32, #tpu.memory_space<vmem>>, vector<4x1xf32>
    %22 = vector.broadcast %21 : vector<4x1xf32> to vector<4x512xf32>
    %23 = arith.mulf %20, %22 : vector<4x512xf32>
    %24 = vector.broadcast %6 : vector<1x512xf32> to vector<4x512xf32>
    %25 = arith.mulf %23, %24 : vector<4x512xf32>
    %26 = vector.broadcast %14 : vector<1x512xf32> to vector<4x512xf32>
    %27 = arith.mulf %25, %26 : vector<4x512xf32>
    %28 = arith.addf %19, %27 : vector<4x512xf32>
    %c16_i32 = arith.constant 16 : i32
    %29 = tpu.dynamic_rotate %0 by %c16_i32 dim 1 : vector<4x512xf32>, i32 -> vector<4x512xf32>
    %c0_8 = arith.constant 0 : index
    %c1_9 = arith.constant 1 : index
    %30 = vector.load %arg3[%c0_8, %c1_9] : memref<4x9xf32, #tpu.memory_space<vmem>>, vector<4x1xf32>
    %31 = vector.broadcast %30 : vector<4x1xf32> to vector<4x512xf32>
    %32 = arith.mulf %29, %31 : vector<4x512xf32>
    %33 = vector.broadcast %6 : vector<1x512xf32> to vector<4x512xf32>
    %34 = arith.mulf %32, %33 : vector<4x512xf32>
    %35 = arith.addf %28, %34 : vector<4x512xf32>
    %c15_i32 = arith.constant 15 : i32
    %36 = tpu.dynamic_rotate %0 by %c15_i32 dim 1 : vector<4x512xf32>, i32 -> vector<4x512xf32>
    %c0_10 = arith.constant 0 : index
    %c2 = arith.constant 2 : index
    %37 = vector.load %arg3[%c0_10, %c2] : memref<4x9xf32, #tpu.memory_space<vmem>>, vector<4x1xf32>
    %38 = vector.broadcast %37 : vector<4x1xf32> to vector<4x512xf32>
    %39 = arith.mulf %36, %38 : vector<4x512xf32>
    %40 = vector.broadcast %6 : vector<1x512xf32> to vector<4x512xf32>
    %41 = arith.mulf %39, %40 : vector<4x512xf32>
    %42 = vector.broadcast %18 : vector<1x512xf32> to vector<4x512xf32>
    %43 = arith.mulf %41, %42 : vector<4x512xf32>
    %44 = arith.addf %35, %43 : vector<4x512xf32>
    %c1_i32_11 = arith.constant 1 : i32
    %45 = tpu.dynamic_rotate %0 by %c1_i32_11 dim 1 : vector<4x512xf32>, i32 -> vector<4x512xf32>
    %c0_12 = arith.constant 0 : index
    %c3 = arith.constant 3 : index
    %46 = vector.load %arg3[%c0_12, %c3] : memref<4x9xf32, #tpu.memory_space<vmem>>, vector<4x1xf32>
    %47 = vector.broadcast %46 : vector<4x1xf32> to vector<4x512xf32>
    %48 = arith.mulf %45, %47 : vector<4x512xf32>
    %49 = vector.broadcast %14 : vector<1x512xf32> to vector<4x512xf32>
    %50 = arith.mulf %48, %49 : vector<4x512xf32>
    %51 = arith.addf %44, %50 : vector<4x512xf32>
    %c0_13 = arith.constant 0 : index
    %c4 = arith.constant 4 : index
    %52 = vector.load %arg3[%c0_13, %c4] : memref<4x9xf32, #tpu.memory_space<vmem>>, vector<4x1xf32>
    %53 = vector.broadcast %52 : vector<4x1xf32> to vector<4x512xf32>
    %54 = arith.mulf %0, %53 : vector<4x512xf32>
    %55 = arith.addf %51, %54 : vector<4x512xf32>
    %c511_i32 = arith.constant 511 : i32
    %56 = tpu.dynamic_rotate %0 by %c511_i32 dim 1 : vector<4x512xf32>, i32 -> vector<4x512xf32>
    %c0_14 = arith.constant 0 : index
    %c5 = arith.constant 5 : index
    %57 = vector.load %arg3[%c0_14, %c5] : memref<4x9xf32, #tpu.memory_space<vmem>>, vector<4x1xf32>
    %58 = vector.broadcast %57 : vector<4x1xf32> to vector<4x512xf32>
    %59 = arith.mulf %56, %58 : vector<4x512xf32>
    %60 = vector.broadcast %18 : vector<1x512xf32> to vector<4x512xf32>
    %61 = arith.mulf %59, %60 : vector<4x512xf32>
    %62 = arith.addf %55, %61 : vector<4x512xf32>
    %c497_i32 = arith.constant 497 : i32
    %63 = tpu.dynamic_rotate %0 by %c497_i32 dim 1 : vector<4x512xf32>, i32 -> vector<4x512xf32>
    %c0_15 = arith.constant 0 : index
    %c6 = arith.constant 6 : index
    %64 = vector.load %arg3[%c0_15, %c6] : memref<4x9xf32, #tpu.memory_space<vmem>>, vector<4x1xf32>
    %65 = vector.broadcast %64 : vector<4x1xf32> to vector<4x512xf32>
    %66 = arith.mulf %63, %65 : vector<4x512xf32>
    %67 = vector.broadcast %10 : vector<1x512xf32> to vector<4x512xf32>
    %68 = arith.mulf %66, %67 : vector<4x512xf32>
    %69 = vector.broadcast %14 : vector<1x512xf32> to vector<4x512xf32>
    %70 = arith.mulf %68, %69 : vector<4x512xf32>
    %71 = arith.addf %62, %70 : vector<4x512xf32>
    %c496_i32 = arith.constant 496 : i32
    %72 = tpu.dynamic_rotate %0 by %c496_i32 dim 1 : vector<4x512xf32>, i32 -> vector<4x512xf32>
    %c0_16 = arith.constant 0 : index
    %c7 = arith.constant 7 : index
    %73 = vector.load %arg3[%c0_16, %c7] : memref<4x9xf32, #tpu.memory_space<vmem>>, vector<4x1xf32>
    %74 = vector.broadcast %73 : vector<4x1xf32> to vector<4x512xf32>
    %75 = arith.mulf %72, %74 : vector<4x512xf32>
    %76 = vector.broadcast %10 : vector<1x512xf32> to vector<4x512xf32>
    %77 = arith.mulf %75, %76 : vector<4x512xf32>
    %78 = arith.addf %71, %77 : vector<4x512xf32>
    %c495_i32 = arith.constant 495 : i32
    %79 = tpu.dynamic_rotate %0 by %c495_i32 dim 1 : vector<4x512xf32>, i32 -> vector<4x512xf32>
    %c0_17 = arith.constant 0 : index
    %c8 = arith.constant 8 : index
    %80 = vector.load %arg3[%c0_17, %c8] : memref<4x9xf32, #tpu.memory_space<vmem>>, vector<4x1xf32>
    %81 = vector.broadcast %80 : vector<4x1xf32> to vector<4x512xf32>
    %82 = arith.mulf %79, %81 : vector<4x512xf32>
    %83 = vector.broadcast %10 : vector<1x512xf32> to vector<4x512xf32>
    %84 = arith.mulf %82, %83 : vector<4x512xf32>
    %85 = vector.broadcast %18 : vector<1x512xf32> to vector<4x512xf32>
    %86 = arith.mulf %84, %85 : vector<4x512xf32>
    %87 = arith.addf %78, %86 : vector<4x512xf32>
    %c0_18 = arith.constant 0 : index
    %c0_19 = arith.constant 0 : index
    %88 = vector.load %arg4[%c0_18, %c0_19] : memref<4x1xf32, #tpu.memory_space<vmem>>, vector<4x1xf32>
    %89 = vector.broadcast %88 : vector<4x1xf32> to vector<4x512xf32>
    %90 = arith.addf %87, %89 : vector<4x512xf32>
    %cst_20 = arith.constant 0.000000e+00 : f32
    %91 = vector.broadcast %cst_20 : f32 to vector<4x512xf32>
    %92 = arith.cmpf oge, %90, %91 : vector<4x512xf32>
    %c0_21 = arith.constant 0 : index
    %c0_22 = arith.constant 0 : index
    %93 = vector.load %arg5[%c0_21, %c0_22] : memref<4x1xf32, #tpu.memory_space<vmem>>, vector<4x1xf32>
    %94 = vector.broadcast %93 : vector<4x1xf32> to vector<4x512xf32>
    %95 = arith.mulf %94, %90 : vector<4x512xf32>
    %96 = arith.select %92, %90, %95 : vector<4x512xi1>, vector<4x512xf32>
    %cst_23 = arith.constant 0.000000e+00 : f32
    %97 = vector.broadcast %cst_23 : f32 to vector<8x512xf32>
    %c0_24 = arith.constant 0 : index
    %c0_25 = arith.constant 0 : index
    %98 = vector.load %arg7[%c0_24, %c0_25] : memref<8x1xf32, #tpu.memory_space<vmem>>, vector<8x1xf32>
    %99 = vector.broadcast %98 : vector<8x1xf32> to vector<8x512xf32>
    %100 = arith.addf %97, %99 : vector<8x512xf32>
    %c0_26 = arith.constant 0 : index
    %c0_27 = arith.constant 0 : index
    %101 = vector.load %arg6[%c0_26, %c0_27] : memref<8x4xf32, #tpu.memory_space<vmem>>, vector<8x1xf32>
    %102 = vector.extract_strided_slice %96 {offsets = [0, 0], sizes = [1, 512], strides = [1, 1]} : vector<4x512xf32> to vector<1x512xf32>
    %103 = vector.broadcast %101 : vector<8x1xf32> to vector<8x512xf32>
    %104 = vector.broadcast %102 : vector<1x512xf32> to vector<8x512xf32>
    %105 = arith.mulf %103, %104 : vector<8x512xf32>
    %106 = arith.addf %100, %105 : vector<8x512xf32>
    %c0_28 = arith.constant 0 : index
    %c1_29 = arith.constant 1 : index
    %107 = vector.load %arg6[%c0_28, %c1_29] : memref<8x4xf32, #tpu.memory_space<vmem>>, vector<8x1xf32>
    %108 = vector.extract_strided_slice %96 {offsets = [1, 0], sizes = [1, 512], strides = [1, 1]} : vector<4x512xf32> to vector<1x512xf32>
    %109 = vector.broadcast %107 : vector<8x1xf32> to vector<8x512xf32>
    %110 = vector.broadcast %108 : vector<1x512xf32> to vector<8x512xf32>
    %111 = arith.mulf %109, %110 : vector<8x512xf32>
    %112 = arith.addf %106, %111 : vector<8x512xf32>
    %c0_30 = arith.constant 0 : index
    %c2_31 = arith.constant 2 : index
    %113 = vector.load %arg6[%c0_30, %c2_31] : memref<8x4xf32, #tpu.memory_space<vmem>>, vector<8x1xf32>
    %114 = vector.extract_strided_slice %96 {offsets = [2, 0], sizes = [1, 512], strides = [1, 1]} : vector<4x512xf32> to vector<1x512xf32>
    %115 = vector.broadcast %113 : vector<8x1xf32> to vector<8x512xf32>
    %116 = vector.broadcast %114 : vector<1x512xf32> to vector<8x512xf32>
    %117 = arith.mulf %115, %116 : vector<8x512xf32>
    %118 = arith.addf %112, %117 : vector<8x512xf32>
    %c0_32 = arith.constant 0 : index
    %c3_33 = arith.constant 3 : index
    %119 = vector.load %arg6[%c0_32, %c3_33] : memref<8x4xf32, #tpu.memory_space<vmem>>, vector<8x1xf32>
    %120 = vector.extract_strided_slice %96 {offsets = [3, 0], sizes = [1, 512], strides = [1, 1]} : vector<4x512xf32> to vector<1x512xf32>
    %121 = vector.broadcast %119 : vector<8x1xf32> to vector<8x512xf32>
    %122 = vector.broadcast %120 : vector<1x512xf32> to vector<8x512xf32>
    %123 = arith.mulf %121, %122 : vector<8x512xf32>
    %124 = arith.addf %118, %123 : vector<8x512xf32>
    %cst_34 = arith.constant 0.000000e+00 : f32
    %125 = vector.broadcast %cst_34 : f32 to vector<8x512xf32>
    %126 = arith.cmpf oge, %124, %125 : vector<8x512xf32>
    %c0_35 = arith.constant 0 : index
    %c0_36 = arith.constant 0 : index
    %127 = vector.load %arg8[%c0_35, %c0_36] : memref<8x1xf32, #tpu.memory_space<vmem>>, vector<8x1xf32>
    %128 = vector.broadcast %127 : vector<8x1xf32> to vector<8x512xf32>
    %129 = arith.mulf %128, %124 : vector<8x512xf32>
    %130 = arith.select %126, %124, %129 : vector<8x512xi1>, vector<8x512xf32>
    %c0_37 = arith.constant 0 : index
    %c0_38 = arith.constant 0 : index
    %131 = vector.load %arg9[%c0_37, %c0_38] : memref<8x512xf32, #tpu.memory_space<vmem>>, vector<8x512xf32>
    tpu.vector_store %arg9[%c0_37, %c0_38], %130 {strides = array<i32>} : memref<8x512xf32, #tpu.memory_space<vmem>>, vector<8x512xf32>,
    return
  }
  func.func @transform_0(%arg0: i32) -> (i32, i32) {
    %c0_i32 = arith.constant 0 : i32
    %c0_i32_0 = arith.constant 0 : i32
    %c0_i32_1 = arith.constant 0 : i32
    return %c0_i32, %c0_i32_0 : i32, i32
  }
  func.func @transform_1(%arg0: i32) -> (i32, i32) {
    %c0_i32 = arith.constant 0 : i32
    %c0_i32_0 = arith.constant 0 : i32
    %c0_i32_1 = arith.constant 0 : i32
    return %c0_i32, %c0_i32_0 : i32, i32
  }
  func.func @transform_2(%arg0: i32) -> (i32, i32) {
    %c0_i32 = arith.constant 0 : i32
    %c0_i32_0 = arith.constant 0 : i32
    %c0_i32_1 = arith.constant 0 : i32
    return %c0_i32, %c0_i32_0 : i32, i32
  }
  func.func @transform_3(%arg0: i32) -> (i32, i32) {
    %c0_i32 = arith.constant 0 : i32
    %c0_i32_0 = arith.constant 0 : i32
    %c0_i32_1 = arith.constant 0 : i32
    return %c0_i32, %c0_i32_0 : i32, i32
  }
  func.func @transform_4(%arg0: i32) -> (i32, i32) {
    %c0_i32 = arith.constant 0 : i32
    %c0_i32_0 = arith.constant 0 : i32
    %c0_i32_1 = arith.constant 0 : i32
    return %c0_i32, %c0_i32_0 : i32, i32
  }
  func.func @transform_5(%arg0: i32) -> (i32, i32) {
    %c0_i32 = arith.constant 0 : i32
    %c0_i32_0 = arith.constant 0 : i32
    %c0_i32_1 = arith.constant 0 : i32
    return %c0_i32, %c0_i32_0 : i32, i32
  }
  func.func @transform_6(%arg0: i32) -> (i32, i32) {
    %c0_i32 = arith.constant 0 : i32
    %c0_i32_0 = arith.constant 0 : i32
    %c0_i32_1 = arith.constant 0 : i32
    return %c0_i32, %c0_i32_0 : i32, i32
  }
  func.func @transform_7(%arg0: i32) -> (i32, i32) {
    %c0_i32 = arith.constant 0 : i32
    %c0_i32_0 = arith.constant 0 : i32
    %c0_i32_1 = arith.constant 0 : i32
    return %c0_i32, %c0_i32_0 : i32, i32
  }
  func.func @transform_8(%arg0: i32) -> (i32, i32) {
    %c0_i32 = arith.constant 0 : i32
    %c0_i32_0 = arith.constant 0 : i32
    %c0_i32_1 = arith.constant 0 : i32
    return %c0_i32, %c0_i32_0 : i32, i32
  }
}

</mosaic_0001>

<bundles_post_ra>
// kernel: tpu_custom_call.1
= control target key start
LH: loop header
LB: loop body
LE: loop exit
PB: predicated region body
PF: predicated region fallthrough
CT: control target
= control target key end

     0   :  { %s677_s9 = smov 17   ;;  %v678_v4 = vmov 1   ;;  %v679_v5 = vmov 2   ;;  %s1169_s0 = inlined_call_operand.vmem [shape: f32[4,512], index: 0, kind: input, shape index: {}]   ;;  %s1170_s1 = inlined_call_operand.vmem [shape: s32[2,512], index: 1, kind: input, shape index: {}]   ;;  %s1171_s2 = inlined_call_operand.vmem [shape: f32[4,9], index: 2, kind: input, shape index: {}]   ;;  %s1172_s3 = inlined_call_operand.vmem [shape: f32[4,1], index: 3, kind: input, shape index: {}]   ;;  %s1173_s4 = inlined_call_operand.vmem [shape: f32[4,1], index: 4, kind: input, shape index: {}]   ;;  %s1174_s5 = inlined_call_operand.vmem [shape: f32[8,4], index: 5, kind: input, shape index: {}]   ;;  %s1175_s6 = inlined_call_operand.vmem [shape: f32[8,1], index: 6, kind: input, shape index: {}]   ;;  %s1176_s7 = inlined_call_operand.vmem [shape: f32[8,1], index: 7, kind: input, shape index: {}]   ;;  %s1177_s8 = inlined_call_operand.hbm [shape: f32[8,512], index: 8, kind: output, shape index: {}]  }
   0x1   :  { %v745_v0 = vld [vmem:[%s1169_s0 + $0x8] sm:$0xff]  ;;  %v750_v1 = vld [vmem:[%s1169_s0] sm:$0xff]  ;;  %636 = vset.pattern.permute.xlu0 %v678_v4  ;;  %637 = vset.pattern.permute.xlu1 %v679_v5 }
   0x2   :  { %57 = vrot.lane.b32.xlu1 %v745_v0, %s677_s9  ;;  %53 = vrot.lane.b32.xlu0 %v750_v1, %s677_s9  ;;  %v756_v2 = vcombine.high %v745_v0, %v745_v0  ;;  %v760_v3 = vcombine.high %v750_v1, %v750_v1 }
   0x6   :  { %59 = vrot.lane.b32.xlu1 %v756_v2, %s677_s9  ;;  %55 = vrot.lane.b32.xlu0 %v760_v3, %s677_s9 }
   0x7   :  { %13 = vsyncpa [#allocation3], 0  ;;  %s680_s0 = smov 16   ;;  %v145_v6 = vld [vmem:[%s1171_s2] sm:$0xf]  ;;  %v681_v8 = vmov 3   ;;  %v61_v25 = vlaneseq }
   0x8   :  { %v232_v7 = vld [vmem:[%s1171_s2] sm:$0xf]  ;;  %s682_s14 = smov 15   ;;  %v683_v10 = vmov 5   ;;  %v684_v12 = vmov 4   ;;  %s685_s19 = smov 1  }
   0x9   :  { %v176_v9 = vld [vmem:[%s1171_s2] sm:$0xf]  ;;  %v686_v13 = vmov 8   ;;  %v687_v15 = vmov 6   ;;  %v688_v18 = vmov 0   ;;  %s689_s26 = smov 127  }
   0xa   :  { %132 = vrot.lane.b32.xlu1 %v750_v1, %s680_s0  ;;  %136 = vrot.lane.b32.xlu0 %v745_v0, %s680_s0  ;;  %v286_v11 = vld [vmem:[%s1171_s2] sm:$0xf]  ;;  %v690_v19 = vmov 7   ;;  %s691_s27 = smov 113   ;;  %s692_s30 = smov 112   ;;  %v837_v27 = vand.u32 127, %v61_v25 }
   0xb   :  { %v404_v14 = vld [vmem:[%s1171_s2] sm:$0xf]  ;;  %s693_s9 = smov 111   ;;  %v80_v48 = vshrl.u32 %v61_v25, 7  ;;  %v694_v53 = vmov 0.0  }
   0xc   :  { %v317_v16 = vld [vmem:[%s1171_s2] sm:$0xf]  ;;  %vm63_vm0 = vcmp.lt.s32.totalorder %v837_v27, 17  ;;  %vm140_vm3 = vcmp.lt.s32.totalorder %v837_v27, 16  ;;  %vm171_vm5 = vcmp.lt.s32.totalorder %v837_v27, 15  ;;  %vm227_vm7 = vcmp.lt.s32.totalorder %v837_v27, 1 }
   0xd   :  { %v68_v17 = vld [vmem:[%s1171_s2] sm:$0xf]  ;;  %v885_v52 = vsub.s32 0, %v80_v48  ;;  %v890_v56 = vsub.s32 2, %v80_v48  ;;  %vm281_vm8 = vcmp.lt.s32.totalorder %v837_v27, 127  ;;  %vm312_vm9 = vcmp.lt.s32.totalorder %v837_v27, 113 }
   0xe   :  { %134 = vrot.lane.b32.xlu1 %v760_v3, %s680_s0  ;;  %148 = vperm.xlu0 %636, %v145_v6   ;;  %v373_v20 = vld [vmem:[%s1171_s2] sm:$0xf]  ;;  %vm368_vm10 = vcmp.lt.s32.totalorder %v837_v27, 112  ;;  %vm399_vm11 = vcmp.lt.s32.totalorder %v837_v27, 111 }
   0xf   :  { %v426_v21 = vld [vmem:[%s1172_s3] sm:$0xf] }
  0x10   :  { %v454_v22 = vld [vmem:[%s1175_s6] sm:$0xff] }
  0x11   :  { %v461_v23 = vld [vmem:[%s1174_s5] sm:$0xff] }
  0x12   :  { %138 = vrot.lane.b32.xlu1 %v756_v2, %s680_s0  ;;  %638 = vset.pattern.permute.xlu0 %v681_v8  ;;  %v440_v24 = vld [vmem:[%s1173_s4] sm:$0xf] }
  0x13   :  { %235 = vperm.xlu0 %638, %v232_v7   ;;  %v579_v26 = vld [vmem:[%s1176_s7] sm:$0xff] }
  0x14   :  { %v871_v45 = vld [vmem:[%s1170_s1] ss:$2 sm:$0xf]  ;;  %v611_v49 = vld [vmem:[%s1170_s1 + $0x1] ss:$2 sm:$0xf] }
  0x15   :  { %vm35_vm1 = vcmp.ge.s32.totalorder %v871_v45, 1  ;;  %vm41_vm2 = vcmp.ge.s32.totalorder %v611_v49, 1  ;;  %vm44_vm4 = vcmp.le.s32.totalorder %v611_v49, 14  ;;  %vm38_vm6 = vcmp.le.s32.totalorder %v871_v45, 14  ;;  %s696_s1 = smov [#allocation2]  }
  0x16   :  { %163 = vrot.lane.b32.xlu1 %v750_v1, %s682_s14  ;;  %v612_v54 = vsel %vm35_vm1, 1.0, %v694_v53  ;;  %v887_v55 = vsel %vm41_vm2, 1.0, %v694_v53  ;;  %s603_s17 = sshll.u32 %s696_s1, 4  ;;  %s604_s17 = int_to_ptr.vmem [resolvable:$true] %s603_s17 }
  0x17   :  { %167 = vrot.lane.b32.xlu0 %v745_v0, %s682_s14  ;;  %v901_v60 = vrot.slane %v612_v54, %v885_v52  ;;  %v905_v62 = vrot.slane %v887_v55, %v885_v52  ;;  %s653_s18 = scalar_lea.vmem %s604_s17, 512  ;;  %p658_p1 = scmp.lt.s32.totalorder %s604_s17, %s604_s17 }
  0x18   :  { %640 = vset.pattern.permute.xlu0 %v683_v10  ;;  %p654_p0 = scmp.ne.s32.totalorder %s604_s17, %s653_s18  ;;  %p659_p2 = scmp.lt.s32.totalorder %s653_s18, %s653_s18 }
  0x1a   :  { %179 = vperm.xlu1 %637, %v176_v9   ;;  %p660_p3 = por %p659_p2, %p658_p1 }
  0x1b   :  { %289 = vperm.xlu0 %640, %v286_v11  }
  0x1c   :  { %p661_p4 = pnand %p660_p3, %p654_p0 }
  0x1e   :  { %639 = vset.pattern.permute.xlu1 %v684_v12 }
  0x1f   :  { %251 = vperm.xlu1 %639, %v232_v7   ;;  %221 = vrot.lane.b32.xlu0 %v760_v3, %s685_s19 }
  0x20   :  { %643 = vset.pattern.permute.xlu0 %v686_v13 }
  0x23   :  { %165 = vrot.lane.b32.xlu1 %v760_v3, %s682_s14  ;;  %225 = vrot.lane.b32.xlu0 %v756_v2, %s685_s19 }
  0x24   :  { %641 = vset.pattern.permute.xlu1 %v687_v15 }
  0x27   :  { %169 = vrot.lane.b32.xlu1 %v756_v2, %s682_s14  ;;  %407 = vperm.xlu0 %643, %v404_v14  }
  0x2b   :  { %320 = vperm.xlu1 %641, %v317_v16   ;;  %644 = vset.pattern.permute.xlu0 %v688_v18 }
  0x2c   :  { %71 = vperm.xlu0 %644, %v68_v17  }
  0x2f   :  { %219 = vrot.lane.b32.xlu1 %v750_v1, %s685_s19 }
  0x30   :  { %277 = vrot.lane.b32.xlu0 %v745_v0, %s689_s26  ;;  %642 = vset.pattern.permute.xlu1 %v690_v19 }
  0x33   :  { %223 = vrot.lane.b32.xlu1 %v745_v0, %s685_s19 }
  0x34   :  { %304 = vrot.lane.b32.xlu0 %v750_v1, %s691_s27 }
  0x37   :  { %376 = vperm.xlu1 %642, %v373_v20   ;;  %v695_v20 = vmov 839922192  }
  0x38   :  { %308 = vrot.lane.b32.xlu0 %v745_v0, %s691_s27 }
  0x3b   :  { %273 = vrot.lane.b32.xlu1 %v750_v1, %s689_s26 }
  0x3c   :  { %360 = vrot.lane.b32.xlu0 %v750_v1, %s692_s30  ;;  %645 = vset.pattern.permute.xlu1 %v688_v18 }
  0x3f   :  { %275 = vrot.lane.b32.xlu1 %v760_v3, %s689_s26 }
  0x40   :  { %364 = vrot.lane.b32.xlu0 %v745_v0, %s692_s30 }
  0x43   :  { %279 = vrot.lane.b32.xlu1 %v756_v2, %s689_s26 }
  0x44   :  { %391 = vrot.lane.b32.xlu0 %v750_v1, %s693_s9 }
  0x47   :  { %306 = vrot.lane.b32.xlu1 %v760_v3, %s691_s27 }
  0x48   :  { %395 = vrot.lane.b32.xlu0 %v745_v0, %s693_s9 }
  0x4b   :  { %310 = vrot.lane.b32.xlu1 %v756_v2, %s691_s27 }
  0x4c   :  { %429 = vperm.xlu0 %644, %v426_v21   ;;  %v254_v21 = vunpack.c.l.s4 %v695_v20 }
  0x4f   :  { %362 = vrot.lane.b32.xlu1 %v760_v3, %s692_s30 }
  0x50   :  { %457 = vperm.xlu0 %644, %v454_v22   ;;  %v936_v22 = vsub.s32 1, %v80_v48 }
  0x53   :  { %366 = vrot.lane.b32.xlu1 %v756_v2, %s692_s30 }
  0x54   :  { %647 = vset.pattern.permute.xlu0 %v679_v5  ;;  %v915_v5 = vrot.slane %v612_v54, %v890_v56 }
  0x55   :  { %520 = vperm.xlu0 %647, %v461_v23  }
  0x57   :  { %393 = vrot.lane.b32.xlu1 %v760_v3, %s693_s9 }
  0x59   :  { %650 = vset.pattern.permute.xlu0 %v688_v18 }
  0x5b   :  { %397 = vrot.lane.b32.xlu1 %v756_v2, %s693_s9 }
  0x5f   :  { %443 = vperm.xlu1 %645, %v440_v24   ;;  %v940_v24 = vsub.s32 3, %v80_v48 }
  0x61   :  { %v94_v49 = vrot.slane %v612_v54, %v940_v24 }
  0x63   :  { %464 = vperm.xlu1 %645, %v461_v23  }
  0x67   :  { %646 = vset.pattern.permute.xlu1 %v678_v4 }
  0x68   :  { %492 = vperm.xlu1 %646, %v461_v23  }
  0x6c   :  { %648 = vset.pattern.permute.xlu1 %v681_v8  ;;  %v920_v8 = vrot.slane %v887_v55, %v890_v56 }
  0x6d   :  { %548 = vperm.xlu1 %648, %v461_v23  }
  0x71   :  { %649 = vset.pattern.permute.xlu1 %v688_v18 }
  0x72   :  { %582 = vperm.xlu1 %649, %v579_v26   ;;  %v255_v26 = vunpack.c.0.s8 %v254_v21 }
  0x74   :  { %v58_v28 = vpop.permute.xlu1 %57  ;;  %v54_v31 = vpop.permute.xlu0 %53 }
  0x78   :  { %v60_v29 = vpop.permute.xlu1 %59  ;;  %v56_v33 = vpop.permute.xlu0 %55 }
  0x79   :  { %v842_v30 = vsel %vm63_vm0, %v58_v28, %v60_v29  ;;  %v67_v58 = vsel %vm63_vm0, %v60_v29, %v54_v31  ;;  %v65_v63 = vsel %vm63_vm0, %v56_v33, %v58_v28  ;;  %v66_v25 = vsel %vm63_vm0, %v54_v31, %v56_v33 }
  0x7a   :  { %v615_v29 = vsel %vm44_vm4, 1.0, %v694_v53  ;;  %v258_v33 = vsub.s32 %v255_v26, %v80_v48 }
  0x7c   :  { %v844_v32 = vpop.permute.xlu1 %132  ;;  %v848_v35 = vpop.permute.xlu0 %136 }
  0x80   :  { %v846_v34 = vpop.permute.xlu1 %134 }
  0x81   :  { %v142_v2 = vsel %vm140_vm3, %v846_v34, %v848_v35  ;;  %v143_v45 = vsel %vm140_vm3, %v844_v32, %v846_v34 }
  0x84   :  { %v852_v37 = vpop.permute.xlu1 %138 }
  0x85   :  { %v144_v59 = vsel %vm140_vm3, %v852_v37, %v844_v32  ;;  %v141_v34 = vsel %vm140_vm3, %v848_v35, %v852_v37 }
  0x88   :  { %v856_v39 = vpop.permute.xlu1 %163 }
  0x8d   :  { %v850_v36 = vpop.permute.xlu0 %148 }
  0x8e   :  { %v151_v3 = vmul.f32 %v850_v36, %v144_v59  ;;  %v153_v6 = vmul.f32 %v850_v36, %v142_v2  ;;  %v86_v59 = vrot.slane %v612_v54, %v936_v22 }
  0x90   :  { %v155_v12 = vmul.f32 %v151_v3, %v901_v60  ;;  %v157_v14 = vmul.f32 %v153_v6, %v915_v5  ;;  %v961_v3 = vrot.slane %v615_v29, %v936_v22  ;;  %v968_v6 = vrot.slane %v615_v29, %v885_v52 }
  0x92   :  { %v854_v38 = vpop.permute.xlu0 %235 }
  0x96   :  { %v858_v40 = vpop.permute.xlu0 %167 }
  0x99   :  { %v860_v41 = vpop.permute.xlu1 %179 }
  0x9a   :  { %v862_v42 = vpop.permute.xlu0 %289 }
  0x9e   :  { %v864_v43 = vpop.permute.xlu1 %251  ;;  %v866_v44 = vpop.permute.xlu0 %221 }
  0x9f   :  { %v259_v26 = vrot.slane %v864_v43, %v258_v33 }
  0xa2   :  { %v873_v46 = vpop.permute.xlu1 %165  ;;  %v875_v47 = vpop.permute.xlu0 %225 }
  0xa3   :  { %v174_v2 = vsel %vm171_vm5, %v856_v39, %v873_v46 }
  0xa4   :  { %v183_v48 = vmul.f32 %v860_v41, %v174_v2 }
  0xa6   :  { %v881_v50 = vpop.permute.xlu1 %169  ;;  %v883_v51 = vpop.permute.xlu0 %407  ;;  %v187_v21 = vmul.f32 %v183_v48, %v86_v59 }
  0xa7   :  { %v175_v31 = vsel %vm171_vm5, %v881_v50, %v856_v39  ;;  %v975_v39 = vrot.slane %v887_v55, %v936_v22  ;;  %v172_v32 = vsel %vm171_vm5, %v858_v40, %v881_v50 }
  0xa8   :  { %v185_v35 = vmul.f32 %v860_v41, %v172_v32 }
  0xaa   :  { %v892_v57 = vpop.permute.xlu1 %320 }
  0xab   :  { %v72_v61 = vpop.permute.xlu0 %71 }
  0xac   :  { %v74_v4 = vmul.f32 %v72_v61, %v67_v58  ;;  %v76_v7 = vmul.f32 %v72_v61, %v65_v63  ;;  %v75_v58 = vmul.f32 %v72_v61, %v66_v25  ;;  %v77_v54 = vmul.f32 %v72_v61, %v842_v30 }
  0xad   :  { %v182_v30 = vmul.f32 %v860_v41, %v175_v31 }
  0xae   :  { %v99_v9 = vmul.f32 %v901_v60, %v74_v4  ;;  %v923_v10 = vpop.permute.xlu1 %219  ;;  %v101_v11 = vmul.f32 %v915_v5, %v76_v7  ;;  %v964_v4 = vrot.slane %v615_v29, %v890_v56  ;;  %v971_v7 = vrot.slane %v615_v29, %v940_v24 }
  0xaf   :  { %v932_v17 = vpop.permute.xlu0 %277  ;;  %v186_v37 = vmul.f32 %v182_v30, %v901_v60 }
  0xb0   :  { %v124_v13 = vmul.f32 %v905_v62, %v99_v9  ;;  %v126_v15 = vmul.f32 %v920_v8, %v101_v11  ;;  %v100_v9 = vmul.f32 %v86_v59, %v75_v58  ;;  %v231_v58 = vsel %vm227_vm7, %v875_v47, %v923_v10 }
  0xb2   :  { %v930_v16 = vadd.f32 %v155_v12, %v124_v13  ;;  %v224_v18 = vpop.permute.xlu1 %223  ;;  %v934_v19 = vadd.f32 %v157_v14, %v126_v15  ;;  %v613_v12 = vsel %vm38_vm6, 1.0, %v694_v53  ;;  %v152_v13 = vmul.f32 %v850_v36, %v143_v45 }
  0xb3   :  { %v945_v28 = vpop.permute.xlu0 %304  ;;  %v173_v14 = vsel %vm171_vm5, %v873_v46, %v858_v40  ;;  %v102_v53 = vmul.f32 %v94_v49, %v77_v54  ;;  %v1001_v15 = vrot.slane %v887_v55, %v940_v24  ;;  %v154_v46 = vmul.f32 %v850_v36, %v141_v34 }
  0xb4   :  { %v125_v20 = vmul.f32 %v975_v39, %v100_v9  ;;  %v1008_v40 = vrot.slane %v613_v12, %v885_v52  ;;  %v184_v50 = vmul.f32 %v860_v41, %v173_v14  ;;  %v156_v25 = vmul.f32 %v152_v13, %v86_v59 }
  0xb5   :  { %v230_v36 = vsel %vm227_vm7, %v923_v10, %v866_v44  ;;  %v1019_v29 = vrot.slane %v613_v12, %v936_v22  ;;  %v127_v41 = vmul.f32 %v1001_v15, %v102_v53  ;;  %v228_v60 = vsel %vm227_vm7, %v224_v18, %v875_v47 }
  0xb6   :  { %v938_v23 = vpop.permute.xlu1 %376  ;;  %v229_v43 = vsel %vm227_vm7, %v866_v44, %v224_v18  ;;  %v158_v2 = vmul.f32 %v154_v46, %v94_v49  ;;  %v160_v31 = vadd.f32 %v156_v25, %v125_v20  ;;  %v1035_v33 = vrot.slane %v613_v12, %v890_v56 }
  0xb7   :  { %v983_v61 = vpop.permute.xlu0 %308  ;;  %v1038_v54 = vrot.slane %v613_v12, %v940_v24  ;;  %v188_v10 = vmul.f32 %v184_v50, %v915_v5  ;;  %v212_v9 = vmul.f32 %v961_v3, %v187_v21  ;;  %v189_v45 = vmul.f32 %v185_v35, %v94_v49 }
  0xb8   :  { %v211_v47 = vmul.f32 %v968_v6, %v186_v37  ;;  %v238_v44 = vmul.f32 %v854_v38, %v231_v58  ;;  %v239_v18 = vmul.f32 %v854_v38, %v230_v36  ;;  %v240_v30 = vmul.f32 %v854_v38, %v229_v43 }
  0xb9   :  { %v241_v13 = vmul.f32 %v854_v38, %v228_v60  ;;  %v261_v14 = vmul.f32 %v259_v26, %v750_v1  ;;  %v262_v12 = vmul.f32 %v259_v26, %v745_v0  ;;  %v162_v32 = vadd.f32 %v158_v2, %v127_v41 }
  0xba   :  { %v948_v63 = vpop.permute.xlu1 %273  ;;  %v215_v5 = vadd.f32 %v211_v47, %v930_v16  ;;  %v216_v49 = vadd.f32 %v212_v9, %v160_v31  ;;  %v213_v38 = vmul.f32 %v964_v4, %v188_v10  ;;  %v214_v1 = vmul.f32 %v971_v7, %v189_v45 }
  0xbb   :  { %v1032_v59 = vpop.permute.xlu0 %360  ;;  %v242_v50 = vmul.f32 %v238_v44, %v905_v62  ;;  %v243_v21 = vmul.f32 %v239_v18, %v975_v39  ;;  %v244_v35 = vmul.f32 %v240_v30, %v920_v8  ;;  %v245_v37 = vmul.f32 %v241_v13, %v1001_v15 }
  0xbc   :  { %v217_v25 = vadd.f32 %v213_v38, %v934_v19  ;;  %v218_v26 = vadd.f32 %v214_v1, %v162_v32  ;;  %v265_v44 = vcombine.high %v261_v14, %v261_v14 }
  0xbd   :  { %v247_v41 = vadd.f32 %v243_v21, %v216_v49 }
  0xbe   :  { %v276_v11 = vpop.permute.xlu1 %275  ;;  %v248_v45 = vadd.f32 %v244_v35, %v217_v25  ;;  %v249_v47 = vadd.f32 %v245_v37, %v218_v26 }
  0xbf   :  { %v283_v0 = vsel %vm281_vm8, %v276_v11, %v932_v17  ;;  %v284_v16 = vsel %vm281_vm8, %v948_v63, %v276_v11  ;;  %v365_v46 = vpop.permute.xlu0 %364  ;;  %v246_v11 = vadd.f32 %v242_v50, %v215_v5 }
  0xc0   :  { %v292_v60 = vmul.f32 %v862_v42, %v284_v16  ;;  %v293_v43 = vmul.f32 %v862_v42, %v283_v0  ;;  %v270_v0 = vadd.f32 %v265_v44, %v247_v41  ;;  %v271_v16 = vadd.f32 %v262_v12, %v248_v45 }
  0xc1   :  { %v269_v1 = vadd.f32 %v261_v14, %v246_v11 }
  0xc2   :  { %v280_v55 = vpop.permute.xlu1 %279  ;;  %v296_v5 = vmul.f32 %v292_v60, %v968_v6  ;;  %v297_v49 = vmul.f32 %v293_v43, %v961_v3 }
  0xc3   :  { %v282_v2 = vsel %vm281_vm8, %v932_v17, %v280_v55  ;;  %v285_v19 = vsel %vm281_vm8, %v280_v55, %v948_v63  ;;  %v266_v63 = vcombine.high %v262_v12, %v262_v12  ;;  %v392_v55 = vpop.permute.xlu0 %391 }
  0xc4   :  { %v294_v30 = vmul.f32 %v862_v42, %v282_v2  ;;  %v300_v25 = vadd.f32 %v296_v5, %v269_v1  ;;  %v301_v26 = vadd.f32 %v297_v49, %v270_v0 }
  0xc6   :  { %v307_v48 = vpop.permute.xlu1 %306  ;;  %v298_v35 = vmul.f32 %v294_v30, %v964_v4 }
  0xc7   :  { %v314_v34 = vsel %vm312_vm9, %v307_v48, %v983_v61  ;;  %v315_v53 = vsel %vm312_vm9, %v945_v28, %v307_v48 }
  0xc8   :  { %v323_v36 = vmul.f32 %v892_v57, %v315_v53  ;;  %v324_v58 = vmul.f32 %v892_v57, %v314_v34 }
  0xca   :  { %v311_v20 = vpop.permute.xlu1 %310  ;;  %v348_v18 = vmul.f32 %v1008_v40, %v323_v36 }
  0xcb   :  { %v313_v31 = vsel %vm312_vm9, %v983_v61, %v311_v20  ;;  %v316_v10 = vsel %vm312_vm9, %v311_v20, %v945_v28  ;;  %v349_v61 = vmul.f32 %v1019_v29, %v324_v58  ;;  %v295_v28 = vmul.f32 %v862_v42, %v285_v19 }
  0xcc   :  { %v325_v13 = vmul.f32 %v892_v57, %v313_v31  ;;  %v326_v32 = vmul.f32 %v892_v57, %v316_v10  ;;  %v272_v20 = vadd.f32 %v266_v63, %v249_v47  ;;  %v352_v50 = vmul.f32 %v348_v18, %v905_v62  ;;  %v396_v62 = vpop.permute.xlu0 %395 }
  0xcd   :  { %v353_v42 = vmul.f32 %v349_v61, %v975_v39  ;;  %v299_v37 = vmul.f32 %v295_v28, %v971_v7  ;;  %v302_v31 = vadd.f32 %v298_v35, %v271_v16 }
  0xce   :  { %v363_v9 = vpop.permute.xlu1 %362  ;;  %v350_v14 = vmul.f32 %v1035_v33, %v325_v13  ;;  %v351_v12 = vmul.f32 %v1038_v54, %v326_v32  ;;  %v356_v60 = vadd.f32 %v352_v50, %v300_v25 }
  0xcf   :  { %v370_v48 = vsel %vm368_vm10, %v363_v9, %v365_v46  ;;  %v371_v17 = vsel %vm368_vm10, %v1032_v59, %v363_v9  ;;  %v357_v43 = vadd.f32 %v353_v42, %v301_v26  ;;  %v303_v10 = vadd.f32 %v299_v37, %v272_v20 }
  0xd0   :  { %v379_v34 = vmul.f32 %v938_v23, %v371_v17  ;;  %v380_v53 = vmul.f32 %v938_v23, %v370_v48  ;;  %v354_v9 = vmul.f32 %v350_v14, %v920_v8  ;;  %v355_v45 = vmul.f32 %v351_v12, %v1001_v15 }
  0xd2   :  { %v367_v38 = vpop.permute.xlu1 %366  ;;  %v383_v39 = vmul.f32 %v379_v34, %v1008_v40  ;;  %v384_v36 = vmul.f32 %v380_v53, %v1019_v29  ;;  %v358_v13 = vadd.f32 %v354_v9, %v302_v31  ;;  %v359_v32 = vadd.f32 %v355_v45, %v303_v10 }
  0xd3   :  { %v369_v57 = vsel %vm368_vm10, %v365_v46, %v367_v38  ;;  %v372_v21 = vsel %vm368_vm10, %v367_v38, %v1032_v59 }
  0xd4   :  { %v381_v58 = vmul.f32 %v938_v23, %v369_v57  ;;  %v382_v59 = vmul.f32 %v938_v23, %v372_v21  ;;  %v387_v47 = vadd.f32 %v383_v39, %v356_v60  ;;  %v388_v23 = vadd.f32 %v384_v36, %v357_v43 }
  0xd6   :  { %v394_v46 = vpop.permute.xlu1 %393  ;;  %v385_v63 = vmul.f32 %v381_v58, %v1035_v33  ;;  %v386_v18 = vmul.f32 %v382_v59, %v1038_v54 }
  0xd7   :  { %v401_v11 = vsel %vm399_vm11, %v394_v46, %v396_v62  ;;  %v402_v41 = vsel %vm399_vm11, %v392_v55, %v394_v46 }
  0xd8   :  { %v410_v2 = vmul.f32 %v883_v51, %v402_v41  ;;  %v411_v19 = vmul.f32 %v883_v51, %v401_v11  ;;  %v389_v27 = vadd.f32 %v385_v63, %v358_v13 }
  0xda   :  { %v414_v48 = vmul.f32 %v410_v2, %v1008_v40  ;;  %v415_v17 = vmul.f32 %v411_v19, %v1019_v29  ;;  %v398_v44 = vpop.permute.xlu1 %397  ;;  %v430_v29 = vpop.permute.xlu0 %429 }
  0xdb   :  { %v400_v61 = vsel %vm399_vm11, %v396_v62, %v398_v44  ;;  %v403_v30 = vsel %vm399_vm11, %v398_v44, %v392_v55  ;;  %v390_v55 = vadd.f32 %v386_v18, %v359_v32 }
  0xdc   :  { %v418_v8 = vmul.f32 %v414_v48, %v968_v6  ;;  %v419_v15 = vmul.f32 %v415_v17, %v961_v3  ;;  %v412_v28 = vmul.f32 %v883_v51, %v400_v61  ;;  %v413_v40 = vmul.f32 %v883_v51, %v403_v30 }
  0xde   :  { %v422_v5 = vadd.f32 %v418_v8, %v387_v47  ;;  %v423_v49 = vadd.f32 %v419_v15, %v388_v23  ;;  %v416_v34 = vmul.f32 %v412_v28, %v1035_v33  ;;  %v417_v53 = vmul.f32 %v413_v40, %v1038_v54  ;;  %v444_v38 = vpop.permute.xlu1 %443  ;;  %v458_v50 = vpop.permute.xlu0 %457 }
  0xe0   :  { %v420_v6 = vmul.f32 %v416_v34, %v964_v4  ;;  %v421_v3 = vmul.f32 %v417_v53, %v971_v7  ;;  %v432_v1 = vadd.f32 %v430_v29, %v422_v5  ;;  %v433_v0 = vadd.f32 %v430_v29, %v423_v49 }
  0xe2   :  { %v424_v16 = vadd.f32 %v420_v6, %v389_v27  ;;  %v425_v51 = vadd.f32 %v421_v3, %v390_v55  ;;  %vm436_vm12 = vcmp.ge.f32.partialorder %v432_v1, 0.0  ;;  %vm437_vm13 = vcmp.ge.f32.partialorder %v433_v0, 0.0  ;;  %v465_v20 = vpop.permute.xlu1 %464  ;;  %v521_v26 = vpop.permute.xlu0 %520 }
  0xe3   :  { %v446_v42 = vmul.f32 %v444_v38, %v432_v1  ;;  %v447_v57 = vmul.f32 %v444_v38, %v433_v0 }
  0xe4   :  { %v434_v33 = vadd.f32 %v430_v29, %v424_v16  ;;  %v435_v21 = vadd.f32 %v430_v29, %v425_v51 }
  0xe5   :  { %v450_v54 = vsel %vm436_vm12, %v432_v1, %v446_v42  ;;  %v451_v35 = vsel %vm437_vm13, %v433_v0, %v447_v57 }
  0xe6   :  { %vm438_vm14 = vcmp.ge.f32.partialorder %v434_v33, 0.0  ;;  %vm439_vm15 = vcmp.ge.f32.partialorder %v435_v21, 0.0  ;;  %v448_v37 = vmul.f32 %v444_v38, %v434_v33  ;;  %v449_v4 = vmul.f32 %v444_v38, %v435_v21 }
  0xe7   :  { %v470_v7 = vrot.slane %v450_v54, %v885_v52  ;;  %v474_v14 = vrot.slane %v451_v35, %v885_v52  ;;  %v526_v12 = vrot.slane %v450_v54, %v890_v56  ;;  %v530_v25 = vrot.slane %v451_v35, %v890_v56  ;;  %v493_v62 = vpop.permute.xlu1 %492 }
  0xe8   :  { %v452_v39 = vsel %vm438_vm14, %v434_v33, %v448_v37  ;;  %v453_v36 = vsel %vm439_vm15, %v435_v21, %v449_v4  ;;  %v498_v46 = vrot.slane %v450_v54, %v936_v22  ;;  %v502_v58 = vrot.slane %v451_v35, %v936_v22 }
  0xe9   :  { %v478_v59 = vrot.slane %v452_v39, %v885_v52  ;;  %v482_v11 = vrot.slane %v453_v36, %v885_v52  ;;  %v483_v41 = vmul.f32 %v470_v7, %v465_v20  ;;  %v484_v60 = vmul.f32 %v474_v14, %v465_v20 }
  0xea   :  { %v534_v43 = vrot.slane %v452_v39, %v890_v56  ;;  %v538_v2 = vrot.slane %v453_v36, %v890_v56  ;;  %v539_v19 = vmul.f32 %v526_v12, %v521_v26  ;;  %v540_v31 = vmul.f32 %v530_v25, %v521_v26 }
  0xeb   :  { %v485_v10 = vmul.f32 %v478_v59, %v465_v20  ;;  %v486_v9 = vmul.f32 %v482_v11, %v465_v20  ;;  %v487_v45 = vadd.f32 %v483_v41, %v458_v50  ;;  %v488_v47 = vadd.f32 %v484_v60, %v458_v50 }
  0xec   :  { %v541_v23 = vmul.f32 %v534_v43, %v521_v26  ;;  %v542_v48 = vmul.f32 %v538_v2, %v521_v26  ;;  %v506_v17 = vrot.slane %v452_v39, %v936_v22  ;;  %v510_v44 = vrot.slane %v453_v36, %v936_v22  ;;  %v549_v63 = vpop.permute.xlu1 %548 }
  0xed   :  { %v489_v52 = vadd.f32 %v485_v10, %v458_v50  ;;  %v490_v18 = vadd.f32 %v486_v9, %v458_v50  ;;  %v511_v61 = vmul.f32 %v498_v46, %v493_v62  ;;  %v512_v30 = vmul.f32 %v502_v58, %v493_v62 }
  0xee   :  { %v513_v8 = vmul.f32 %v506_v17, %v493_v62  ;;  %v514_v15 = vmul.f32 %v510_v44, %v493_v62  ;;  %v554_v56 = vrot.slane %v450_v54, %v940_v24  ;;  %v558_v28 = vrot.slane %v451_v35, %v940_v24 }
  0xef   :  { %v515_v40 = vadd.f32 %v511_v61, %v487_v45  ;;  %v516_v29 = vadd.f32 %v512_v30, %v488_v47  ;;  %v562_v13 = vrot.slane %v452_v39, %v940_v24  ;;  %v566_v32 = vrot.slane %v453_v36, %v940_v24 }
  0xf0   :  { %v517_v5 = vadd.f32 %v513_v8, %v489_v52  ;;  %v518_v49 = vadd.f32 %v514_v15, %v490_v18  ;;  %v567_v22 = vmul.f32 %v554_v56, %v549_v63  ;;  %v568_v34 = vmul.f32 %v558_v28, %v549_v63 }
  0xf1   :  { %v543_v53 = vadd.f32 %v539_v19, %v515_v40  ;;  %v544_v38 = vadd.f32 %v540_v31, %v516_v29  ;;  %v569_v6 = vmul.f32 %v562_v13, %v549_v63  ;;  %v570_v3 = vmul.f32 %v566_v32, %v549_v63  ;;  %v583_v1 = vpop.permute.xlu1 %582 }
  0xf2   :  { %v545_v27 = vadd.f32 %v541_v23, %v517_v5  ;;  %v546_v55 = vadd.f32 %v542_v48, %v518_v49 }
  0xf3   :  { %v571_v0 = vadd.f32 %v567_v22, %v543_v53  ;;  %v572_v16 = vadd.f32 %v568_v34, %v544_v38 }
  0xf4   :  { %v573_v51 = vadd.f32 %v569_v6, %v545_v27  ;;  %v574_v20 = vadd.f32 %v570_v3, %v546_v55 }
  0xf5   :  { %vm575_vm0 = vcmp.ge.f32.partialorder %v571_v0, 0.0  ;;  %vm576_vm1 = vcmp.ge.f32.partialorder %v572_v16, 0.0  ;;  %v585_v24 = vmul.f32 %v583_v1, %v571_v0  ;;  %v586_v50 = vmul.f32 %v583_v1, %v572_v16 }
  0xf6   :  { %vm577_vm2 = vcmp.ge.f32.partialorder %v573_v51, 0.0  ;;  %vm578_vm3 = vcmp.ge.f32.partialorder %v574_v20, 0.0  ;;  %v587_v42 = vmul.f32 %v583_v1, %v573_v51  ;;  %v588_v57 = vmul.f32 %v583_v1, %v574_v20 }
  0xf7   :  { %v589_v33 = vsel %vm575_vm0, %v571_v0, %v585_v24  ;;  %v590_v21 = vsel %vm576_vm1, %v572_v16, %v586_v50 }
  0xf8   :  { %v591_v54 = vsel %vm577_vm2, %v573_v51, %v587_v42  ;;  %v592_v35 = vsel %vm578_vm3, %v574_v20, %v588_v57  ;;  %593 = vst [vmem:[#allocation2] sm:$0xff] %v589_v33  ;;  %594 = vst [vmem:[#allocation2 + $0x8] sm:$0xff] %v590_v21 }
  0xf9   :  { %595 = vst [vmem:[#allocation2 + $0x10] sm:$0xff] %v591_v54  ;;  %596 = vst [vmem:[#allocation2 + $0x18] sm:$0xff] %v592_v35 }
  0xfa   :  { %664 = shalt.err (!%p661_p4)
}
  0xfb   :  { %s665_s21 = scalar_lea.hbm %s1177_s8, 512 }
  0xfc   :  { %p666_p5 = scmp.ne.s32.totalorder %s1177_s8, %s665_s21  ;;  %p669_p6 = scmp.lt.u32.totalorder %s665_s21, %s1177_s8 }
  0xfe   :  { %p671_p7 = pnand %p669_p6, %p666_p5 }
 0x100   :  { %674 = shalt.err (!%p671_p7)
}
 0x101   :  { %606 = dma.vmem_to_hbm [thread:$0]  %s604_s17, 512, %s1177_s8, [#allocation3]  }
 0x102   :  { %675 = dma.done.wait [#allocation3], 512  }
 0x103   :  { %676 = vsyncadd [#allocation3], 4294966784 }
 0x104   :  { %610 = vsyncpa [#allocation3], 1 }

</bundles_post_ra>
